<compile_context>
chip_gen: v7x
topology: tpu7x:2x2x1
jax: 0.10.0
libtpu: 0.0.40
codegen_flags: <defaults>
</compile_context>

<pallas_src>
import functools

import jax
import jax.numpy as jnp
from jax.experimental import pallas as pl
from jax.experimental.pallas import tpu as pltpu


def _model_fwd_kernel(x_ref, w1_ref, b1_ref, w2_ref, b2_ref, out_ref, acc_ref,
                      *, inv_s):
    # x_ref : (tb, ts, D) activation tile (batch tile x sequence tile)
    # w1_ref: (D, H)   b1_ref: (1, H)
    # w2_ref: (H, C)   b2_ref: (1, C)
    # out_ref: (tb, C) logits
    # acc_ref: (tb, H) f32 partial sums of x @ W1 over the sequence axis
    si = pl.program_id(1)

    @pl.when(si == 0)
    def _():
        acc_ref[...] = jnp.zeros_like(acc_ref)

    tb, ts, D = x_ref.shape
    H = w1_ref.shape[1]
    x = x_ref[...].astype(jnp.float32)

    if ts % 8 == 0 or tb == 1:
        # MXU-first: contract D before reducing over S (reduce becomes H-wide).
        h_all = jnp.dot(x.reshape(tb * ts, D), w1_ref[...],
                        preferred_element_type=jnp.float32)          # (tb*ts, H)
        acc_ref[...] += jnp.sum(h_all.reshape(tb, ts, H), axis=1)    # (tb, H)
    else:
        # Fallback for odd seq tiles where the leading-dim collapse would need
        # a relayout: pool first, then one (tb, D) @ (D, H) matmul.
        acc_ref[...] += jnp.dot(jnp.sum(x, axis=1), w1_ref[...],
                                preferred_element_type=jnp.float32)

    @pl.when(si == pl.num_programs(1) - 1)
    def _():
        h = acc_ref[...] * jnp.float32(inv_s) + b1_ref[...]          # (tb, H)
        logits = jnp.dot(h, w2_ref[...],
                         preferred_element_type=jnp.float32) + b2_ref[...]
        out_ref[...] = logits.astype(out_ref.dtype)


def _usable_vmem_bytes():
    # Generation-aware budget: ~48 MiB on v7x (64 MiB/core), ~96 MiB on
    # v5e/v6e (128 MiB/core).  Conservative fallback if the query fails.
    try:
        cap = int(pltpu.get_tpu_info().vmem_capacity_bytes)
    except Exception:
        cap = 64 << 20
    return max(16 << 20, min(cap * 3 // 4, cap - (16 << 20)))


def _per_row_vmem(ts, D, H, C, itemsize):
    # Double-buffered x + out rows, f32 cast of x (if narrow input dtype),
    # f32 matmul intermediate, accumulator row.
    cast = ts * D * 4 if itemsize < 4 else 0
    return 2 * (ts * D * itemsize + C * 4) + ts * H * 4 + cast + H * 4


def _pick_tiles(B, S, D, H, C, itemsize, usable, target_block_bytes):
    w_bytes = (D * H + H + H * C + C) * 4
    headroom = 4 << 20
    budget = max(1 << 20, usable - 2 * w_bytes - headroom)

    # Sequence tile: full S unless even the minimum batch tile would not fit,
    # in which case pick the largest multiple-of-8 divisor of S that does.
    min_tb = B if B < 16 else 8
    ts = S
    if min_tb * _per_row_vmem(S, D, H, C, itemsize) > budget and S % 8 == 0:
        divisors = [t for t in range(8, S, 8) if S % t == 0]
        if divisors:
            ts = divisors[0]
            for t in reversed(divisors):
                if min_tb * _per_row_vmem(t, D, H, C, itemsize) <= budget:
                    ts = t
                    break

    per_row = _per_row_vmem(ts, D, H, C, itemsize)
    tb_vmem = max(1, budget // per_row)
    tb_target = max(1, target_block_bytes // max(1, ts * D * itemsize))
    tb = int(min(tb_vmem, tb_target, B))
    if B >= 16:
        # Multiple-of-8 tiles and >=2 batch-grid steps so both v7x TensorCores
        # get work under dimension_semantics=("parallel", ...).
        tb = min(tb, max(8, ((B // 2) // 8) * 8))
        tb = max(8, (tb // 8) * 8)
    else:
        tb = B
    return tb, ts, w_bytes, per_row


def _fused_call(x, w1, b1_2d, w2, b2_2d, *, rows, tb, ts, vmem_limit):
    _, S, D = x.shape
    H = w1.shape[1]
    C = w2.shape[1]
    grid = (rows // tb, S // ts)
    itemsize = x.dtype.itemsize
    w_bytes = (D * H + H + H * C + C) * 4
    cost = pl.CostEstimate(
        flops=2 * rows * S * D * H + 2 * rows * H * C,
        transcendentals=0,
        bytes_accessed=rows * S * D * itemsize + w_bytes + rows * C * 4,
    )
    kernel = functools.partial(_model_fwd_kernel, inv_s=1.0 / S)
    return pl.pallas_call(
        kernel,
        out_shape=jax.ShapeDtypeStruct((rows, C), jnp.float32),
        grid=grid,
        in_specs=[
            pl.BlockSpec((tb, ts, D), lambda i, j: (i, j, 0)),  # activations
            pl.BlockSpec((D, H), lambda i, j: (0, 0)),          # weights resident
            pl.BlockSpec((1, H), lambda i, j: (0, 0)),
            pl.BlockSpec((H, C), lambda i, j: (0, 0)),
            pl.BlockSpec((1, C), lambda i, j: (0, 0)),
        ],
        out_specs=pl.BlockSpec((tb, C), lambda i, j: (i, 0)),
        scratch_shapes=[pltpu.VMEM((tb, H), jnp.float32)],
        compiler_params=pltpu.CompilerParams(
            dimension_semantics=("parallel", "arbitrary"),
            vmem_limit_bytes=vmem_limit,
        ),
        cost_estimate=cost,
    )(x, w1, b1_2d, w2, b2_2d)


def my_model_forward(x, w1, b1, w2, b2, *, target_block_bytes=16 << 20):
    """Fused mean-pool + Linear(768,128) + Linear(128,20).

    x:  [B, S, D] (f32 or bf16; cast to f32 in-kernel)
    w1: [D, H], b1: [H]   (w1/w2 are torch weights transposed, (in, out) layout)
    w2: [H, C], b2: [C]
    returns: [B, C] float32
    """
    B, S, D = x.shape
    H = w1.shape[1]
    C = w2.shape[1]
    b1_2d = b1.reshape(1, H).astype(jnp.float32)
    b2_2d = b2.reshape(1, C).astype(jnp.float32)
    w1 = w1.astype(jnp.float32)
    w2 = w2.astype(jnp.float32)

    usable = _usable_vmem_bytes()
    tb, ts, w_bytes, per_row = _pick_tiles(
        B, S, D, H, C, x.dtype.itemsize, usable, target_block_bytes)

    main_rows = (B // tb) * tb
    rem = B - main_rows
    vmem_limit = int(min(usable,
                         max(16 << 20, 2 * w_bytes + tb * per_row + (4 << 20))))

    # Main call streams only the full tiles of the original array (no jnp.pad,
    # no bulk copy of x).  A ragged remainder (< tb rows) is handled by a
    # second tiny call whose block equals its full extent.
    out = _fused_call(x, w1, b1_2d, w2, b2_2d,
                      rows=main_rows, tb=tb, ts=ts, vmem_limit=vmem_limit)
    if rem:
        out_rem = _fused_call(x[main_rows:], w1, b1_2d, w2, b2_2d,
                              rows=rem, tb=rem, ts=ts, vmem_limit=vmem_limit)
        out = jnp.concatenate([out, out_rem], axis=0)
    return out


if __name__ == "__main__":
    key = jax.random.PRNGKey(0)
    kx, kw1, kb1, kw2, kb2 = jax.random.split(key, 5)

    # Shapes implied by the module: x = [batch, seq, 768] -> [batch, 20]
    B, S, D, H, C = 2, 8, 768, 128, 20

    x = jax.random.normal(kx, (B, S, D), dtype=jnp.float32)
    # Weights in (in_features, out_features) layout (== torch weight transposed).
    lim1 = 1.0 / jnp.sqrt(D)
    lim2 = 1.0 / jnp.sqrt(H)
    w1 = jax.random.uniform(kw1, (D, H), minval=-lim1, maxval=lim1, dtype=jnp.float32)
    b1 = jax.random.uniform(kb1, (H,), minval=-lim1, maxval=lim1, dtype=jnp.float32)
    w2 = jax.random.uniform(kw2, (H, C), minval=-lim2, maxval=lim2, dtype=jnp.float32)
    b2 = jax.random.uniform(kb2, (C,), minval=-lim2, maxval=lim2, dtype=jnp.float32)

    out = my_model_forward(x, w1, b1, w2, b2)
    out = jax.block_until_ready(out)

    # Pure-JAX reference of the PyTorch forward.
    pooled = x.mean(axis=1)
    ref = jnp.dot(jnp.dot(pooled, w1, precision='highest') + b1, w2,
                  precision='highest') + b2

    assert out.shape == (B, C), out.shape
    assert jnp.allclose(out, ref, rtol=1e-2, atol=1e-2), (out, ref)

    print("KERNEL_OK")
</pallas_src>

<mosaic_0001>
module attributes {stable_mosaic.version = 11 : i64} {
  func.func @_model_fwd_kernel(%arg0: i32, %arg1: i32, %arg2: memref<2x8x768xf32, #tpu.memory_space<vmem>>, %arg3: memref<768x128xf32, #tpu.memory_space<vmem>>, %arg4: memref<1x128xf32, #tpu.memory_space<vmem>>, %arg5: memref<128x20xf32, #tpu.memory_space<vmem>>, %arg6: memref<1x20xf32, #tpu.memory_space<vmem>>, %arg7: memref<2x20xf32, #tpu.memory_space<vmem>>, %arg8: memref<2x128xf32, #tpu.memory_space<vmem>>) attributes {dimension_semantics = [#tpu.dimension_semantics<parallel>, #tpu.dimension_semantics<arbitrary>], iteration_bounds = array<i64: 1, 1>, scalar_prefetch = 0 : i64, scratch_operands = 1 : i64, tpu.core_type = #tpu.core_type<tc>, window_params = [{transform_indices = @transform_0, window_bounds = array<i64: 2, 8, 768>}, {pipeline_mode = #tpu.pipeline_mode<synchronous>, transform_indices = @transform_1, window_bounds = array<i64: 768, 128>}, {pipeline_mode = #tpu.pipeline_mode<synchronous>, transform_indices = @transform_2, window_bounds = array<i64: 1, 128>}, {pipeline_mode = #tpu.pipeline_mode<synchronous>, transform_indices = @transform_3, window_bounds = array<i64: 128, 20>}, {pipeline_mode = #tpu.pipeline_mode<synchronous>, transform_indices = @transform_4, window_bounds = array<i64: 1, 20>}, {transform_indices = @transform_5, window_bounds = array<i64: 2, 20>}]} {
    %c0_i32 = arith.constant 0 : i32
    %0 = arith.cmpi eq, %arg1, %c0_i32 : i32
    %1 = arith.extui %0 : i1 to i32
    %c0_i32_0 = arith.constant 0 : i32
    %2 = arith.cmpi ne, %1, %c0_i32_0 : i32
    scf.if %2 {
      %cst_12 = arith.constant 0.000000e+00 : f32
      %15 = vector.broadcast %cst_12 : f32 to vector<2x128xf32>
      %c0_13 = arith.constant 0 : index
      %c0_14 = arith.constant 0 : index
      %16 = vector.load %arg8[%c0_13, %c0_14] : memref<2x128xf32, #tpu.memory_space<vmem>>, vector<2x128xf32>
      tpu.vector_store %arg8[%c0_13, %c0_14], %15 {strides = array<i32>} : memref<2x128xf32, #tpu.memory_space<vmem>>, vector<2x128xf32>,
    } else {
    }
    %c0 = arith.constant 0 : index
    %c0_1 = arith.constant 0 : index
    %c0_2 = arith.constant 0 : index
    %3 = vector.load %arg2[%c0, %c0_1, %c0_2] : memref<2x8x768xf32, #tpu.memory_space<vmem>>, vector<2x8x768xf32>
    %4 = vector.shape_cast %3 : vector<2x8x768xf32> to vector<16x768xf32>
    %c0_3 = arith.constant 0 : index
    %c0_4 = arith.constant 0 : index
    %5 = vector.load %arg3[%c0_3, %c0_4] : memref<768x128xf32, #tpu.memory_space<vmem>>, vector<768x128xf32>
    %cst = arith.constant dense<0.000000e+00> : vector<16x128xf32>
    %6 = tpu.matmul %4, %5, %cst {dimension_numbers = #tpu.dot_dimension_numbers<[1], [0], [0], [1], [0, 0, 1, 1], [], []>} : vector<16x768xf32>, vector<768x128xf32>, vector<16x128xf32> -> vector<16x128xf32>
    %c0_5 = arith.constant 0 : index
    %c0_6 = arith.constant 0 : index
    %7 = vector.load %arg8[%c0_5, %c0_6] : memref<2x128xf32, #tpu.memory_space<vmem>>, vector<2x128xf32>
    %8 = vector.shape_cast %6 : vector<16x128xf32> to vector<2x8x128xf32>
    %cst_7 = arith.constant dense<0.000000e+00> : vector<2x128xf32>
    %9 = vector.multi_reduction <add>, %8, %cst_7 [1] : vector<2x8x128xf32> to vector<2x128xf32>
    %10 = arith.addf %7, %9 : vector<2x128xf32>
    %c0_8 = arith.constant 0 : index
    %c0_9 = arith.constant 0 : index
    %11 = vector.load %arg8[%c0_8, %c0_9] : memref<2x128xf32, #tpu.memory_space<vmem>>, vector<2x128xf32>
    tpu.vector_store %arg8[%c0_8, %c0_9], %10 {strides = array<i32>} : memref<2x128xf32, #tpu.memory_space<vmem>>, vector<2x128xf32>,
    %c0_i32_10 = arith.constant 0 : i32
    %12 = arith.cmpi eq, %arg1, %c0_i32_10 : i32
    %13 = arith.extui %12 : i1 to i32
    %c0_i32_11 = arith.constant 0 : i32
    %14 = arith.cmpi ne, %13, %c0_i32_11 : i32
    scf.if %14 {
      %c0_12 = arith.constant 0 : index
      %c0_13 = arith.constant 0 : index
      %15 = vector.load %arg8[%c0_12, %c0_13] : memref<2x128xf32, #tpu.memory_space<vmem>>, vector<2x128xf32>
      %cst_14 = arith.constant 1.250000e-01 : f32
      %16 = vector.broadcast %cst_14 : f32 to vector<2x128xf32>
      %17 = arith.mulf %15, %16 : vector<2x128xf32>
      %c0_15 = arith.constant 0 : index
      %c0_16 = arith.constant 0 : index
      %18 = vector.load %arg4[%c0_15, %c0_16] : memref<1x128xf32, #tpu.memory_space<vmem>>, vector<1x128xf32>
      %19 = vector.broadcast %18 : vector<1x128xf32> to vector<2x128xf32>
      %20 = arith.addf %17, %19 : vector<2x128xf32>
      %c0_17 = arith.constant 0 : index
      %c0_18 = arith.constant 0 : index
      %21 = vector.load %arg5[%c0_17, %c0_18] : memref<128x20xf32, #tpu.memory_space<vmem>>, vector<128x20xf32>
      %cst_19 = arith.constant dense<0.000000e+00> : vector<2x20xf32>
      %22 = tpu.matmul %20, %21, %cst_19 {dimension_numbers = #tpu.dot_dimension_numbers<[1], [0], [0], [1], [0, 0, 1, 1], [], []>} : vector<2x128xf32>, vector<128x20xf32>, vector<2x20xf32> -> vector<2x20xf32>
      %c0_20 = arith.constant 0 : index
      %c0_21 = arith.constant 0 : index
      %23 = vector.load %arg6[%c0_20, %c0_21] : memref<1x20xf32, #tpu.memory_space<vmem>>, vector<1x20xf32>
      %24 = vector.broadcast %23 : vector<1x20xf32> to vector<2x20xf32>
      %25 = arith.addf %22, %24 : vector<2x20xf32>
      %c0_22 = arith.constant 0 : index
      %c0_23 = arith.constant 0 : index
      %26 = vector.load %arg7[%c0_22, %c0_23] : memref<2x20xf32, #tpu.memory_space<vmem>>, vector<2x20xf32>
      tpu.vector_store %arg7[%c0_22, %c0_23], %25 {strides = array<i32>} : memref<2x20xf32, #tpu.memory_space<vmem>>, vector<2x20xf32>,
    } else {
    }
    return
  }
  func.func @transform_0(%arg0: i32, %arg1: i32) -> (i32, i32, i32) {
    %c0_i32 = arith.constant 0 : i32
    %c0_i32_0 = arith.constant 0 : i32
    return %arg0, %arg1, %c0_i32 : i32, i32, i32
  }
  func.func @transform_1(%arg0: i32, %arg1: i32) -> (i32, i32) {
    %c0_i32 = arith.constant 0 : i32
    %c0_i32_0 = arith.constant 0 : i32
    %c0_i32_1 = arith.constant 0 : i32
    return %c0_i32, %c0_i32_0 : i32, i32
  }
  func.func @transform_2(%arg0: i32, %arg1: i32) -> (i32, i32) {
    %c0_i32 = arith.constant 0 : i32
    %c0_i32_0 = arith.constant 0 : i32
    %c0_i32_1 = arith.constant 0 : i32
    return %c0_i32, %c0_i32_0 : i32, i32
  }
  func.func @transform_3(%arg0: i32, %arg1: i32) -> (i32, i32) {
    %c0_i32 = arith.constant 0 : i32
    %c0_i32_0 = arith.constant 0 : i32
    %c0_i32_1 = arith.constant 0 : i32
    return %c0_i32, %c0_i32_0 : i32, i32
  }
  func.func @transform_4(%arg0: i32, %arg1: i32) -> (i32, i32) {
    %c0_i32 = arith.constant 0 : i32
    %c0_i32_0 = arith.constant 0 : i32
    %c0_i32_1 = arith.constant 0 : i32
    return %c0_i32, %c0_i32_0 : i32, i32
  }
  func.func @transform_5(%arg0: i32, %arg1: i32) -> (i32, i32) {
    %c0_i32 = arith.constant 0 : i32
    %c0_i32_0 = arith.constant 0 : i32
    return %arg0, %c0_i32 : i32, i32
  }
}

</mosaic_0001>

<bundles_post_ra>
// kernel: tpu_custom_call.1
= control target key start
LH: loop header
LB: loop body
LE: loop exit
PB: predicated region body
PF: predicated region fallthrough
CT: control target
= control target key end

     0   :  { %10 = vsyncpa [#allocation4], 0  ;;  %s1010_s0 = inlined_call_operand.vmem [shape: f32[2,8,768], index: 0, kind: input, shape index: {}]   ;;  %s1011_s1 = inlined_call_operand.hbm [shape: f32[768,128], index: 1, kind: input, shape index: {}]   ;;  %s1012_s2 = inlined_call_operand.vmem [shape: f32[1,128], index: 2, kind: input, shape index: {}]   ;;  %s1013_s3 = inlined_call_operand.vmem [shape: f32[128,20], index: 3, kind: input, shape index: {}]   ;;  %s1014_s4 = inlined_call_operand.vmem [shape: f32[1,20], index: 4, kind: input, shape index: {}]   ;;  %s1015_s5 = inlined_call_operand.hbm [shape: f32[2,20], index: 5, kind: output, shape index: {}]  }
   0x1   :  { %11 = vsyncpa [#allocation5], 0  ;;  %s859_s18 = smov [#allocation3]   ;;  %s811_s22 = scalar_lea.hbm %s1011_s1, 12288 }
   0x2   :  { %s19_s19 = sshll.u32 %s859_s18, 4  ;;  %p812_p0 = scmp.ne.s32.totalorder %s1011_s1, %s811_s22  ;;  %s20_s19 = int_to_ptr.vmem [resolvable:$true] %s19_s19 }
   0x3   :  { %p815_p1 = scmp.lt.u32.totalorder %s811_s22, %s1011_s1 }
   0x5   :  { %p817_p2 = pnand %p815_p1, %p812_p0 }
   0x7   :  { %820 = shalt.err (!%p817_p2)
}
   0x8   :  { %s821_s27 = scalar_lea.vmem %s20_s19, 12288  ;;  %p826_p4 = scmp.lt.s32.totalorder %s20_s19, %s20_s19 }
   0x9   :  { %p822_p3 = scmp.ne.s32.totalorder %s20_s19, %s821_s27  ;;  %p827_p5 = scmp.lt.s32.totalorder %s821_s27, %s821_s27 }
   0xb   :  { %p828_p6 = por %p827_p5, %p826_p4 }
   0xd   :  { %p829_p7 = pnand %p828_p6, %p822_p3 }
   0xf   :  { %832 = shalt.err (!%p829_p7)
}
  0x10   :  { %s860_s28 = smov 128   ;;  %s861_s29 = smov 8  }
  0x11   :  { %25 = dma.hbm_to_vmem [thread:$0]  %s1011_s1, 12288, %s20_s19, [#allocation4], %s860_s28, %s860_s28, %s861_s29  }
  0x12   :  { %855 = dma.done.wait [#allocation4], 12288  }
  0x13   :  { %856 = vsyncadd [#allocation4], 4294955008  ;;  %v68_v0 = vld [vmem:[#allocation3 + $0x80] sm:$0xff]  ;;  %v69_v1 = vld [vmem:[#allocation3 + $0x88] sm:$0xff]  ;;  %vm864_vm0 = vmmov 0   ;;  %vm388_vm1 = vcmask 1041409  }
  0x14   :  { %v100_v2 = vld [vmem:[#allocation3 + $0x180] sm:$0xff]  ;;  %v684_v3 = vpack.c.bf16 %v69_v1, %v68_v0  ;;  %v101_v4 = vld [vmem:[#allocation3 + $0x188] sm:$0xff]  ;;  %v70_v11 = vld [vmem:[#allocation3 + $0x90] sm:$0xff]  ;;  %s865_s11 = smov [#allocation6]   ;;  %vm499_vm2 = vcmask 156672  }
  0x15   :  { %v52_v5 = vld [vmem:[#allocation3] sm:$0xff]  ;;  %v53_v6 = vld [vmem:[#allocation3 + $0x8] sm:$0xff]  ;;  %v716_v7 = vpack.c.bf16 %v101_v4, %v100_v2  ;;  %v71_v13 = vld [vmem:[#allocation3 + $0x98] sm:$0xff]  ;;  %s507_s12 = sshll.u32 %s865_s11, 4  ;;  %s508_s12 = int_to_ptr.vmem [resolvable:$true] %s507_s12 }
  0x16   :  { %v686_v8 = vpack.c.bf16 %v53_v6, %v52_v5  ;;  %v84_v9 = vld [vmem:[#allocation3 + $0x100] sm:$0xff]  ;;  %v85_v10 = vld [vmem:[#allocation3 + $0x108] sm:$0xff]  ;;  %685 = vmatprep.subr.bf16.mxu0 %v684_v3  ;;  %v102_v14 = vld [vmem:[#allocation3 + $0x190] sm:$0xff]  ;;  %v688_v16 = vpack.c.bf16 %v71_v13, %v70_v11  ;;  %s833_s13 = scalar_lea.vmem %s508_s12, 32  ;;  %p838_p9 = scmp.lt.s32.totalorder %s508_s12, %s508_s12 }
  0x17   :  { %v718_v12 = vpack.c.bf16 %v85_v10, %v84_v9  ;;  %v103_v15 = vld [vmem:[#allocation3 + $0x198] sm:$0xff]  ;;  %717 = vmatprep.subr.bf16.mxu1 %v716_v7  ;;  %v54_v18 = vld [vmem:[#allocation3 + $0x10] sm:$0xff]  ;;  %v72_v23 = vld [vmem:[#allocation3 + $0xa0] sm:$0xff]  ;;  %p834_p8 = scmp.ne.s32.totalorder %s508_s12, %s833_s13  ;;  %p839_p10 = scmp.lt.s32.totalorder %s833_s13, %s833_s13 }
  0x18   :  { %687 = vmatpush3.bf16.msra.mxu0 %v686_v8  ;;  %v720_v17 = vpack.c.bf16 %v103_v15, %v102_v14  ;;  %v55_v19 = vld [vmem:[#allocation3 + $0x18] sm:$0xff]  ;;  %v86_v20 = vld [vmem:[#allocation3 + $0x110] sm:$0xff]  ;;  %v73_v24 = vld [vmem:[#allocation3 + $0xa8] sm:$0xff] }
  0x19   :  { %719 = vmatpush3.bf16.msra.mxu1 %v718_v12  ;;  %v690_v21 = vpack.c.bf16 %v55_v19, %v54_v18  ;;  %v87_v22 = vld [vmem:[#allocation3 + $0x118] sm:$0xff]  ;;  %689 = vmatprep.subr.bf16.mxu0 %v688_v16  ;;  %v692_v26 = vpack.c.bf16 %v73_v24, %v72_v23  ;;  %v104_v27 = vld [vmem:[#allocation3 + $0x1a0] sm:$0xff]  ;;  %v105_v28 = vld [vmem:[#allocation3 + $0x1a8] sm:$0xff]  ;;  %p840_p11 = por %p839_p10, %p838_p9 }
  0x1a   :  { %721 = vmatprep.subr.bf16.mxu1 %v720_v17  ;;  %v722_v25 = vpack.c.bf16 %v87_v22, %v86_v20  ;;  %v56_v29 = vld [vmem:[#allocation3 + $0x20] sm:$0xff]  ;;  %v724_v30 = vpack.c.bf16 %v105_v28, %v104_v27  ;;  %v57_v31 = vld [vmem:[#allocation3 + $0x28] sm:$0xff]  ;;  %v74_v35 = vld [vmem:[#allocation3 + $0xb0] sm:$0xff] }
  0x1b   :  { %v88_v32 = vld [vmem:[#allocation3 + $0x120] sm:$0xff]  ;;  %v89_v33 = vld [vmem:[#allocation3 + $0x128] sm:$0xff]  ;;  %v694_v34 = vpack.c.bf16 %v57_v31, %v56_v29  ;;  %v75_v36 = vld [vmem:[#allocation3 + $0xb8] sm:$0xff]  ;;  %p841_p12 = pnand %p840_p11, %p834_p8 }
  0x1c   :  { %691 = vmatpush3.bf16.msra.mxu0 %v690_v21  ;;  %v106_v37 = vld [vmem:[#allocation3 + $0x1b0] sm:$0xff]  ;;  %v726_v38 = vpack.c.bf16 %v89_v33, %v88_v32  ;;  %v696_v39 = vpack.c.bf16 %v75_v36, %v74_v35  ;;  %v107_v40 = vld [vmem:[#allocation3 + $0x1b8] sm:$0xff]  ;;  %v76_v46 = vld [vmem:[#allocation3 + $0xc0] sm:$0xff] }
  0x1d   :  { %723 = vmatpush3.bf16.msra.mxu1 %v722_v25  ;;  %693 = vmatprep.subr.bf16.mxu0 %v692_v26  ;;  %v58_v41 = vld [vmem:[#allocation3 + $0x30] sm:$0xff]  ;;  %v59_v42 = vld [vmem:[#allocation3 + $0x38] sm:$0xff]  ;;  %v728_v43 = vpack.c.bf16 %v107_v40, %v106_v37  ;;  %v77_v47 = vld [vmem:[#allocation3 + $0xc8] sm:$0xff] }
  0x1e   :  { %725 = vmatprep.subr.bf16.mxu1 %v724_v30  ;;  %v90_v44 = vld [vmem:[#allocation3 + $0x130] sm:$0xff]  ;;  %v91_v45 = vld [vmem:[#allocation3 + $0x138] sm:$0xff]  ;;  %v108_v48 = vld [vmem:[#allocation3 + $0x1c0] sm:$0xff]  ;;  %v698_v50 = vpack.c.bf16 %v59_v42, %v58_v41  ;;  %v700_v52 = vpack.c.bf16 %v77_v47, %v76_v46 }
  0x1f   :  { %v109_v49 = vld [vmem:[#allocation3 + $0x1c8] sm:$0xff]  ;;  %v730_v51 = vpack.c.bf16 %v91_v45, %v90_v44  ;;  %v60_v53 = vld [vmem:[#allocation3 + $0x40] sm:$0xff]  ;;  %v78_v58 = vld [vmem:[#allocation3 + $0xd0] sm:$0xff] }
  0x20   :  { %695 = vmatpush3.bf16.msra.mxu0 %v694_v34  ;;  %v61_v54 = vld [vmem:[#allocation3 + $0x48] sm:$0xff]  ;;  %v92_v55 = vld [vmem:[#allocation3 + $0x140] sm:$0xff]  ;;  %v732_v56 = vpack.c.bf16 %v109_v49, %v108_v48  ;;  %v79_v59 = vld [vmem:[#allocation3 + $0xd8] sm:$0xff] }
  0x21   :  { %727 = vmatpush3.bf16.msra.mxu1 %v726_v38  ;;  %697 = vmatprep.subr.bf16.mxu0 %v696_v39  ;;  %v93_v57 = vld [vmem:[#allocation3 + $0x148] sm:$0xff]  ;;  %v110_v60 = vld [vmem:[#allocation3 + $0x1d0] sm:$0xff]  ;;  %v111_v61 = vld [vmem:[#allocation3 + $0x1d8] sm:$0xff]  ;;  %v702_v62 = vpack.c.bf16 %v61_v54, %v60_v53  ;;  %v704_v0 = vpack.c.bf16 %v79_v59, %v78_v58 }
  0x22   :  { %729 = vmatprep.subr.bf16.mxu1 %v728_v43  ;;  %v734_v63 = vpack.c.bf16 %v93_v57, %v92_v55  ;;  %v62_v1 = vld [vmem:[#allocation3 + $0x50] sm:$0xff]  ;;  %v63_v2 = vld [vmem:[#allocation3 + $0x58] sm:$0xff]  ;;  %v736_v4 = vpack.c.bf16 %v111_v61, %v110_v60  ;;  %v80_v6 = vld [vmem:[#allocation3 + $0xe0] sm:$0xff] }
  0x23   :  { %v94_v3 = vld [vmem:[#allocation3 + $0x150] sm:$0xff]  ;;  %v95_v5 = vld [vmem:[#allocation3 + $0x158] sm:$0xff]  ;;  %v81_v7 = vld [vmem:[#allocation3 + $0xe8] sm:$0xff]  ;;  %v706_v10 = vpack.c.bf16 %v63_v2, %v62_v1 }
  0x24   :  { %699 = vmatpush3.bf16.msra.mxu0 %v698_v50  ;;  %v112_v8 = vld [vmem:[#allocation3 + $0x1e0] sm:$0xff]  ;;  %v113_v9 = vld [vmem:[#allocation3 + $0x1e8] sm:$0xff]  ;;  %v738_v13 = vpack.c.bf16 %v95_v5, %v94_v3  ;;  %v708_v14 = vpack.c.bf16 %v81_v7, %v80_v6  ;;  %v43_v17 = vld [vmem:[%s1010_s0 + $0x18] sm:$0xff] }
  0x25   :  { %731 = vmatpush3.bf16.msra.mxu1 %v730_v51  ;;  %701 = vmatprep.subr.bf16.mxu0 %v700_v52  ;;  %v64_v11 = vld [vmem:[#allocation3 + $0x60] sm:$0xff]  ;;  %v65_v12 = vld [vmem:[#allocation3 + $0x68] sm:$0xff]  ;;  %v740_v18 = vpack.c.bf16 %v113_v9, %v112_v8  ;;  %v82_v20 = vld [vmem:[#allocation3 + $0xf0] sm:$0xff] }
  0x26   :  { %733 = vmatprep.subr.bf16.mxu1 %v732_v56  ;;  %v96_v15 = vld [vmem:[#allocation3 + $0x160] sm:$0xff]  ;;  %v97_v19 = vld [vmem:[#allocation3 + $0x168] sm:$0xff]  ;;  %v83_v21 = vld [vmem:[#allocation3 + $0xf8] sm:$0xff]  ;;  %287 = vmatprep.mubr.f32.mxu1 %v43_v17  ;;  %v710_v24 = vpack.c.bf16 %v65_v12, %v64_v11 }
  0x27   :  { %v41_v16 = vld [vmem:[%s1010_s0 + $0x8] sm:$0xff]  ;;  %v114_v22 = vld [vmem:[#allocation3 + $0x1f0] sm:$0xff]  ;;  %v115_v23 = vld [vmem:[#allocation3 + $0x1f8] sm:$0xff]  ;;  %v742_v25 = vpack.c.bf16 %v97_v19, %v96_v15  ;;  %v712_v26 = vpack.c.bf16 %v83_v21, %v82_v20 }
  0x28   :  { %703 = vmatpush3.bf16.msra.mxu0 %v702_v62  ;;  %212 = vmatprep.mubr.f32.mxu0 %v41_v16  ;;  %v66_v27 = vld [vmem:[#allocation3 + $0x70] sm:$0xff]  ;;  %v67_v28 = vld [vmem:[#allocation3 + $0x78] sm:$0xff]  ;;  %v744_v30 = vpack.c.bf16 %v115_v23, %v114_v22  ;;  %v132_v32 = vld [vmem:[#allocation3 + $0x280] sm:$0xff] }
  0x29   :  { %735 = vmatpush3.bf16.msra.mxu1 %v734_v63  ;;  %705 = vmatprep.subr.bf16.mxu0 %v704_v0  ;;  %v98_v29 = vld [vmem:[#allocation3 + $0x170] sm:$0xff]  ;;  %v99_v31 = vld [vmem:[#allocation3 + $0x178] sm:$0xff]  ;;  %v133_v33 = vld [vmem:[#allocation3 + $0x288] sm:$0xff]  ;;  %v714_v34 = vpack.c.bf16 %v67_v28, %v66_v27 }
  0x2a   :  { %737 = vmatprep.subr.bf16.mxu1 %v736_v4  ;;  %v746_v35 = vpack.c.bf16 %v99_v31, %v98_v29  ;;  %v748_v36 = vpack.c.bf16 %v133_v33, %v132_v32  ;;  %v116_v37 = vld [vmem:[#allocation3 + $0x200] sm:$0xff]  ;;  %v117_v38 = vld [vmem:[#allocation3 + $0x208] sm:$0xff]  ;;  %v134_v39 = vld [vmem:[#allocation3 + $0x290] sm:$0xff]  ;;  %v862_v31 = vmov 0.0|0.0  }
  0x2b   :  { %v135_v40 = vld [vmem:[#allocation3 + $0x298] sm:$0xff]  ;;  %v750_v42 = vpack.c.bf16 %v117_v38, %v116_v37  ;;  %v42_v43 = vld [vmem:[%s1010_s0 + $0x10] sm:$0xff]  ;;  %v136_v47 = vld [vmem:[#allocation3 + $0x2a0] sm:$0xff] }
  0x2c   :  { %707 = vmatpush3.bf16.msra.mxu0 %v706_v10  ;;  %v40_v41 = vld [vmem:[%s1010_s0] sm:$0xff]  ;;  %v752_v44 = vpack.c.bf16 %v135_v40, %v134_v39  ;;  %v118_v45 = vld [vmem:[#allocation3 + $0x210] sm:$0xff]  ;;  %v137_v48 = vld [vmem:[#allocation3 + $0x2a8] sm:$0xff]  ;;  %v863_v40 = vmov 0.0  }
  0x2d   :  { %739 = vmatpush3.bf16.msra.mxu1 %v738_v13  ;;  %709 = vmatprep.subr.bf16.mxu0 %v708_v14  ;;  %v119_v46 = vld [vmem:[#allocation3 + $0x218] sm:$0xff]  ;;  %v49_v50 = vld [vmem:[%s1010_s0 + $0x48] sm:$0xff]  ;;  %v46_v52 = vld [vmem:[%s1010_s0 + $0x30] sm:$0xff]  ;;  %v756_v53 = vpack.c.bf16 %v137_v48, %v136_v47  ;;  %39 = vst [vmem:[#allocation2] sm:$0x3] %v863_v40 }
  0x2e   :  { %741 = vmatprep.subr.bf16.mxu1 %v740_v18  ;;  %v47_v49 = vld [vmem:[%s1010_s0 + $0x38] sm:$0xff]  ;;  %v754_v51 = vpack.c.bf16 %v119_v46, %v118_v45  ;;  %v120_v54 = vld [vmem:[#allocation3 + $0x220] sm:$0xff]  ;;  %v121_v55 = vld [vmem:[#allocation3 + $0x228] sm:$0xff] }
  0x2f   :  { %v48_v56 = vld [vmem:[%s1010_s0 + $0x40] sm:$0xff]  ;;  %v138_v57 = vld [vmem:[#allocation3 + $0x2b0] sm:$0xff]  ;;  %v45_v59 = vld [vmem:[%s1010_s0 + $0x28] sm:$0xff]  ;;  %v758_v60 = vpack.c.bf16 %v121_v55, %v120_v54 }
  0x30   :  { %711 = vmatpush3.bf16.msra.mxu0 %v710_v24  ;;  %v139_v58 = vld [vmem:[#allocation3 + $0x2b8] sm:$0xff]  ;;  %v122_v62 = vld [vmem:[#allocation3 + $0x230] sm:$0xff]  ;;  %v140_v0 = vld [vmem:[#allocation3 + $0x2c0] sm:$0xff] }
  0x31   :  { %743 = vmatpush3.bf16.msra.mxu1 %v742_v25  ;;  %713 = vmatprep.subr.bf16.mxu0 %v712_v26  ;;  %v760_v61 = vpack.c.bf16 %v139_v58, %v138_v57  ;;  %v123_v63 = vld [vmem:[#allocation3 + $0x238] sm:$0xff]  ;;  %v141_v1 = vld [vmem:[#allocation3 + $0x2c8] sm:$0xff]  ;;  %v124_v4 = vld [vmem:[#allocation3 + $0x240] sm:$0xff] }
  0x32   :  { %745 = vmatprep.subr.bf16.mxu1 %v744_v30  ;;  %v762_v2 = vpack.c.bf16 %v123_v63, %v122_v62  ;;  %v764_v3 = vpack.c.bf16 %v141_v1, %v140_v0  ;;  %v125_v5 = vld [vmem:[#allocation3 + $0x248] sm:$0xff]  ;;  %v142_v6 = vld [vmem:[#allocation3 + $0x2d0] sm:$0xff]  ;;  %v143_v7 = vld [vmem:[#allocation3 + $0x2d8] sm:$0xff] }
  0x33   :  { %v766_v8 = vpack.c.bf16 %v125_v5, %v124_v4  ;;  %v768_v9 = vpack.c.bf16 %v143_v7, %v142_v6  ;;  %v126_v10 = vld [vmem:[#allocation3 + $0x250] sm:$0xff]  ;;  %v127_v11 = vld [vmem:[#allocation3 + $0x258] sm:$0xff]  ;;  %v144_v12 = vld [vmem:[#allocation3 + $0x2e0] sm:$0xff] }
  0x34   :  { %715 = vmatpush3.bf16.msra.mxu0 %v714_v34  ;;  %v145_v13 = vld [vmem:[#allocation3 + $0x2e8] sm:$0xff]  ;;  %v770_v14 = vpack.c.bf16 %v127_v11, %v126_v10  ;;  %v128_v16 = vld [vmem:[#allocation3 + $0x260] sm:$0xff]  ;;  %v146_v18 = vld [vmem:[#allocation3 + $0x2f0] sm:$0xff] }
  0x35   :  { %747 = vmatpush3.bf16.msra.mxu1 %v746_v35  ;;  %749 = vmatprep.subr.bf16.mxu0 %v748_v36  ;;  %v772_v15 = vpack.c.bf16 %v145_v13, %v144_v12  ;;  %v129_v17 = vld [vmem:[#allocation3 + $0x268] sm:$0xff]  ;;  %v147_v19 = vld [vmem:[#allocation3 + $0x2f8] sm:$0xff]  ;;  %v130_v22 = vld [vmem:[#allocation3 + $0x270] sm:$0xff] }
  0x36   :  { %v774_v20 = vpack.c.bf16 %v129_v17, %v128_v16  ;;  %v776_v21 = vpack.c.bf16 %v147_v19, %v146_v18  ;;  %v131_v23 = vld [vmem:[#allocation3 + $0x278] sm:$0xff]  ;;  %v50_v27 = vld [vmem:[%s1010_s0 + $0x50] sm:$0xff]  ;;  %v407_v29 = vld [vmem:[%s1013_s3 + $0x8] sm:$0xff]  ;;  %780 = vmatprep.subr.bf16.mxu1 %v862_v31 }
  0x37   :  { %213 = vmatmul.mubr.f32.vlgmr.msra.gmra.mrb[0].mxu0 %v40_v41  ;;  %v778_v24 = vpack.c.bf16 %v131_v23, %v130_v22  ;;  %v44_v25 = vld [vmem:[%s1010_s0 + $0x20] sm:$0xff]  ;;  %v51_v26 = vld [vmem:[%s1010_s0 + $0x58] sm:$0xff]  ;;  %v408_v32 = vld [vmem:[%s1013_s3 + $0x10] sm:$0xff] }
  0x38   :  { %288 = vmatmul.mubr.f32.vlgmr.msra.gmra.mrb[0].mxu1 %v42_v43  ;;  %751 = vmatpush3.bf16.msra.mxu0 %v750_v42  ;;  %v406_v28 = vld [vmem:[%s1013_s3] sm:$0xff]  ;;  %v409_v33 = vld [vmem:[%s1013_s3 + $0x18] sm:$0xff]  ;;  %v411_v36 = vld [vmem:[%s1013_s3 + $0x28] sm:$0xff] }
  0x39   :  { %753 = vmatprep.subr.bf16.mxu0 %v752_v44  ;;  %217 = vmatprep.mubr.f32.mxu0 %v47_v49  ;;  %v781_v30 = vpack.c.bf16 %v407_v29, %v406_v28  ;;  %v784_v34 = vpack.c.bf16 %v409_v33, %v408_v32  ;;  %v410_v35 = vld [vmem:[%s1013_s3 + $0x20] sm:$0xff]  ;;  %v412_v38 = vld [vmem:[%s1013_s3 + $0x30] sm:$0xff]  ;;  %v413_v39 = vld [vmem:[%s1013_s3 + $0x38] sm:$0xff] }
  0x3a   :  { %292 = vmatprep.mubr.f32.mxu1 %v49_v50  ;;  %v787_v37 = vpack.c.bf16 %v411_v36, %v410_v35  ;;  %v790_v41 = vpack.c.bf16 %v413_v39, %v412_v38  ;;  %v414_v42 = vld [vmem:[%s1013_s3 + $0x40] sm:$0xff]  ;;  %v415_v43 = vld [vmem:[%s1013_s3 + $0x48] sm:$0xff]  ;;  %v416_v45 = vld [vmem:[%s1013_s3 + $0x50] sm:$0xff] }
  0x3b   :  { %218 = vmatmul.mubr.f32.gmra.mrb[2].mxu0 %v46_v52  ;;  %782 = vmatpush3.bf16.msra.mxu1 %v781_v30  ;;  %v793_v44 = vpack.c.bf16 %v415_v43, %v414_v42  ;;  %v417_v46 = vld [vmem:[%s1013_s3 + $0x58] sm:$0xff]  ;;  %v418_v48 = vld [vmem:[%s1013_s3 + $0x60] sm:$0xff]  ;;  %v419_v49 = vld [vmem:[%s1013_s3 + $0x68] sm:$0xff] }
  0x3c   :  { %755 = vmatpush3.bf16.msra.mxu0 %v754_v51  ;;  %293 = vmatmul.mubr.f32.gmra.mrb[2].mxu1 %v48_v56  ;;  %v796_v47 = vpack.c.bf16 %v417_v46, %v416_v45  ;;  %v799_v50 = vpack.c.bf16 %v419_v49, %v418_v48  ;;  %v420_v51 = vld [vmem:[%s1013_s3 + $0x70] sm:$0xff]  ;;  %v421_v52 = vld [vmem:[%s1013_s3 + $0x78] sm:$0xff]  ;;  %v516_v28 = vld [vmem:[%s1012_s2] ss:$0 sm:$0xff] }
  0x3d   :  { %757 = vmatprep.subr.bf16.mxu0 %v756_v53  ;;  %362 = vmatprep.mubr.f32.mxu0 %v45_v59  ;;  %v802_v53 = vpack.c.bf16 %v421_v52, %v420_v51 }
  0x3e   :  { %783 = vmatprep.subr.bf16.mxu1 %v862_v31  ;;  %681 = vmatprep.mubr.msk.f32.mxu1 %vm864_vm0, %v863_v40 }
  0x3f   :  { %785 = vmatpush3.bf16.msra.mxu1 %v784_v34 }
  0x40   :  { %759 = vmatpush3.bf16.msra.mxu0 %v758_v60  ;;  %786 = vmatprep.subr.bf16.mxu1 %v862_v31 }
  0x41   :  { %761 = vmatprep.subr.bf16.mxu0 %v760_v61 }
  0x43   :  { %788 = vmatpush3.bf16.msra.mxu1 %v787_v37 }
  0x44   :  { %763 = vmatpush3.bf16.msra.mxu0 %v762_v2  ;;  %789 = vmatprep.subr.bf16.mxu1 %v862_v31 }
  0x45   :  { %765 = vmatprep.subr.bf16.mxu0 %v764_v3 }
  0x47   :  { %791 = vmatpush3.bf16.msra.mxu1 %v790_v41 }
  0x48   :  { %767 = vmatpush3.bf16.msra.mxu0 %v766_v8  ;;  %792 = vmatprep.subr.bf16.mxu1 %v862_v31 }
  0x49   :  { %769 = vmatprep.subr.bf16.mxu0 %v768_v9 }
  0x4b   :  { %794 = vmatpush3.bf16.msra.mxu1 %v793_v44 }
  0x4c   :  { %771 = vmatpush3.bf16.msra.mxu0 %v770_v14  ;;  %795 = vmatprep.subr.bf16.mxu1 %v862_v31 }
  0x4d   :  { %773 = vmatprep.subr.bf16.mxu0 %v772_v15 }
  0x4f   :  { %797 = vmatpush3.bf16.msra.mxu1 %v796_v47 }
  0x50   :  { %775 = vmatpush3.bf16.msra.mxu0 %v774_v20  ;;  %798 = vmatprep.subr.bf16.mxu1 %v862_v31 }
  0x51   :  { %777 = vmatprep.subr.bf16.mxu0 %v776_v21 }
  0x53   :  { %800 = vmatpush3.bf16.msra.mxu1 %v799_v50 }
  0x54   :  { %779 = vmatpush3.bf16.msra.mxu0 %v778_v24  ;;  %801 = vmatprep.subr.bf16.mxu1 %v862_v31  ;;  %v373_v24 = vld [vmem:[#allocation2] sm:$0x3] }
  0x55   :  { %v517_v31 = vld [vmem:[%s1014_s4] ss:$0 sm:$0xff] }
  0x57   :  { %363 = vmatmul.mubr.f32.vlgmr.msra.gmra.mrb[4].mxu0 %v44_v25  ;;  %803 = vmatpush3.bf16.msra.mxu1 %v802_v53 }
  0x58   :  { %367 = vmatprep.mubr.f32.mxu0 %v51_v26 }
  0x5b   :  { %368 = vmatmul.mubr.f32.gmra.mrb[6].mxu0 %v50_v27 }
 0x10a   :  { %v550_v54 = vpop.f32.mrb[0].mxu0 }
 0x10b   :  { %v588_v55 = vpop.f32.mrb[0].mxu1  ;;  %v551_v56 = vpop.f32.mrb[1].mxu0 }
 0x10c   :  { %v552_v57 = vadd.f32 %v551_v56, %v550_v54  ;;  %v589_v58 = vpop.f32.mrb[1].mxu1 }
 0x10d   :  { %v590_v59 = vadd.f32 %v589_v58, %v588_v55 }
 0x10e   :  { %v553_v60 = vpop.f32.mrb[2].mxu0 }
 0x10f   :  { %v290_v61 = vadd.f32 %v590_v59, %v552_v57  ;;  %v591_v62 = vpop.f32.mrb[2].mxu1  ;;  %v554_v63 = vpop.f32.mrb[3].mxu0 }
 0x110   :  { %v555_v0 = vadd.f32 %v554_v63, %v553_v60  ;;  %v592_v1 = vpop.f32.mrb[3].mxu1 }
 0x111   :  { %v593_v2 = vadd.f32 %v592_v1, %v591_v62 }
 0x113   :  { %v295_v3 = vadd.f32 %v593_v2, %v555_v0 }
 0x12a   :  { %v626_v4 = vpop.f32.mrb[4].mxu0 }
 0x12b   :  { %v627_v5 = vpop.f32.mrb[5].mxu0 }
 0x12c   :  { %v628_v6 = vadd.f32 %v627_v5, %v626_v4 }
 0x12e   :  { %v365_v7 = vadd.f32 %v628_v6, %v290_v61  ;;  %v629_v8 = vpop.f32.mrb[6].mxu0 }
 0x12f   :  { %v630_v9 = vpop.f32.mrb[7].mxu0 }
 0x130   :  { %v374_v10 = vrot.slane %v365_v7, 4  ;;  %v631_v11 = vadd.f32 %v630_v9, %v629_v8 }
 0x132   :  { %v375_v12 = vadd.f32 %v374_v10, %v365_v7  ;;  %v370_v13 = vadd.f32 %v631_v11, %v295_v3 }
 0x134   :  { %v376_v14 = vrot.slane %v375_v12, 2  ;;  %v380_v15 = vrot.slane %v370_v13, 4 }
 0x136   :  { %v377_v16 = vadd.f32 %v376_v14, %v375_v12  ;;  %v381_v17 = vadd.f32 %v380_v15, %v370_v13 }
 0x138   :  { %v382_v18 = vrot.slane %v381_v17, 2  ;;  %v378_v19 = vrot.slane %v377_v16, 1 }
 0x13a   :  { %v383_v20 = vadd.f32 %v382_v18, %v381_v17  ;;  %v379_v22 = vadd.f32 %v378_v19, %v377_v16 }
 0x13c   :  { %v384_v21 = vrot.slane %v383_v20, 1 }
 0x13e   :  { %v385_v23 = vadd.f32 %v384_v21, %v383_v20 }
 0x140   :  { %v389_v25 = vsel %vm388_vm1, %v385_v23, %v379_v22 }
 0x141   :  { %v391_v26 = vadd.f32 %v389_v25, %v373_v24 }
 0x143   :  { %392 = vst [vmem:[#allocation2] sm:$0x3] %v391_v26 }
 0x14a   :  { %v396_v27 = vld [vmem:[#allocation2] sm:$0x3] }
 0x14b   :  { %v397_v29 = vmul.f32 0.125, %v396_v27 }
 0x14d   :  { %v405_v30 = vadd.f32 %v516_v28, %v397_v29 }
 0x14f   :  { %682 = vmatmul.mubr.f32.vlgmr.msra.gmra.mrb[4].mxu1 %v405_v30 }
 0x222   :  { %v495_v32 = vpop.f32.mrb[4].mxu1 }
 0x223   :  { %v496_v33 = vadd.f32 %v517_v31, %v495_v32  ;;  %v683_v34 = vpop.f32.mrb[5].mxu1 }
 0x225   :  { %500 = vst.msk [vmem:[#allocation6] sm:$0x3] %vm499_vm2, %v496_v33 }
 0x226   :  { %844 = shalt.err (!%p841_p12)
}
 0x227   :  { %s845_s15 = scalar_lea.hbm %s1015_s5, 32 }
 0x228   :  { %p846_p13 = scmp.ne.s32.totalorder %s1015_s5, %s845_s15  ;;  %p849_p0 = scmp.lt.u32.totalorder %s845_s15, %s1015_s5 }
 0x22a   :  { %p851_p1 = pnand %p849_p0, %p846_p13 }
 0x22c   :  { %854 = shalt.err (!%p851_p1)
}
 0x22d   :  { %510 = dma.vmem_to_hbm [thread:$0]  %s508_s12, 32, %s1015_s5, [#allocation5]  }
 0x22e   :  { %857 = dma.done.wait [#allocation5], 32  }
 0x22f   :  { %858 = vsyncadd [#allocation5], 4294967264 }
 0x230   :  { %514 = vsyncpa [#allocation4], 1 }
 0x231   :  { %515 = vsyncpa [#allocation5], 1 }

</bundles_post_ra>
